<compile_context>
chip_gen: v6e
topology: v6e:2x2x1
jax: 0.10.0
libtpu: 0.0.40
codegen_flags: <defaults>
</compile_context>

<pallas_src>
import jax
import jax.numpy as jnp
from jax import lax
from jax.experimental import pallas as pl
from jax.experimental.pallas import tpu as pltpu

BN_EPS = 1e-5


def _bn_relu_deconv1x1_kernel(x_ref, gamma_ref, beta_ref, w_ref, o_ref):
    # x_ref:     (N, Cin, HW)   channels on sublanes, HW (multiple of 128) on lanes
    # gamma/beta:(1, Cin, 1)
    # w_ref:     (Cin, Cout, 1)
    # o_ref:     (N, Cout, HW)
    x = x_ref[...]
    n, cin, hw = x.shape
    inv_m = 1.0 / float(n * hw)

    # BatchNorm2d (training mode): per-channel mean / biased variance over (N, HW).
    mean = jnp.sum(jnp.sum(x, axis=2, keepdims=True), axis=0, keepdims=True) * inv_m
    xc = x - mean                                                     # (N, Cin, HW)
    var = jnp.sum(jnp.sum(xc * xc, axis=2, keepdims=True), axis=0, keepdims=True) * inv_m
    a = lax.rsqrt(var + BN_EPS) * gamma_ref[...]                      # (1, Cin, 1)
    xr = jnp.maximum(xc * a + beta_ref[...], 0.0)                     # ReLU

    # 1x1 (transposed) conv over channels: K = Cin is tiny, so do an unrolled
    # VPU broadcast-FMA contraction instead of feeding the MXU.
    w = w_ref[...]                                                    # (Cin, Cout, 1)
    acc = xr[:, 0:1, :] * w[0:1]                                      # (N, Cout, HW)
    for c in range(1, cin):
        acc = acc + xr[:, c:c + 1, :] * w[c:c + 1]
    o_ref[...] = acc                                                  # lane-dense store


def basic_us_block1_forward(x, gamma, beta, w, bias, *, stride=2):
    """x: (N, Cin, H, W) f32 -> (N, Cout, (H-1)*stride+2, (W-1)*stride+2)."""
    assert stride >= 2, "output_padding=1 requires stride >= 2 in PyTorch"
    N, Cin, H, W = x.shape
    Cout = w.shape[1]
    HW = H * W

    # Free reshapes only — no NCHW->NHWC transpose pass over HBM.
    x3 = x.reshape(N, Cin, HW).astype(jnp.float32)
    g3 = gamma.reshape(1, Cin, 1).astype(jnp.float32)
    b3 = beta.reshape(1, Cin, 1).astype(jnp.float32)
    w3 = w.reshape(Cin, Cout, 1).astype(jnp.float32)

    # NOTE: at realistic sizes, tile the N/HW axes (grid over M, BN stats via a
    # reduction pass or sum/sum-sq accumulators) and mark them "parallel" —
    # mandatory on v7x (64 MiB VMEM, 2 TCs).  At these toy shapes the whole
    # problem is ~25 KiB of VMEM, so a single resident block is optimal.
    y3 = pl.pallas_call(
        _bn_relu_deconv1x1_kernel,
        out_shape=jax.ShapeDtypeStruct((N, Cout, HW), jnp.float32),
        grid=(1,),
        in_specs=[
            pl.BlockSpec((N, Cin, HW), lambda i: (0, 0, 0)),
            pl.BlockSpec((1, Cin, 1), lambda i: (0, 0, 0)),
            pl.BlockSpec((1, Cin, 1), lambda i: (0, 0, 0)),
            pl.BlockSpec((Cin, Cout, 1), lambda i: (0, 0, 0)),
        ],
        out_specs=pl.BlockSpec((N, Cout, HW), lambda i: (0, 0, 0)),
        compiler_params=pltpu.CompilerParams(dimension_semantics=("arbitrary",)),
    )(x3, g3, b3, w3)

    y = y3.reshape(N, Cout, H, W)  # free (row-major metadata change only)

    # ConvTranspose2d(k=1, stride, output_padding=1): zero-stuff via interior
    # padding of (stride-1), pad 1 at the high edge, then bias at EVERY position
    # (holes included).  Under jit this is one fused XLA op: a single HBM pass
    # over the 4x-larger output.
    pad_cfg = ((0, 0, 0), (0, 0, 0), (0, 1, stride - 1), (0, 1, stride - 1))
    out = lax.pad(y, jnp.zeros((), y.dtype), pad_cfg)
    return out + bias.reshape(1, Cout, 1, 1).astype(jnp.float32)


def _reference(x, gamma, beta, w, bias, stride=2):
    """Pure-JAX reference matching the PyTorch forward (training-mode BN)."""
    mean = x.mean(axis=(0, 2, 3), keepdims=True)
    var = ((x - mean) ** 2).mean(axis=(0, 2, 3), keepdims=True)
    xhat = (x - mean) / jnp.sqrt(var + BN_EPS)
    xhat = xhat * gamma.reshape(1, -1, 1, 1) + beta.reshape(1, -1, 1, 1)
    xr = jnp.maximum(xhat, 0.0)
    y = jnp.einsum("ncij,cd->ndij", xr, w)
    N, Cout = y.shape[0], y.shape[1]
    H, W_ = x.shape[2], x.shape[3]
    Hout = (H - 1) * stride + 2
    Wout = (W_ - 1) * stride + 2
    out = jnp.broadcast_to(bias.reshape(1, -1, 1, 1), (N, Cout, Hout, Wout))
    out = out.at[:, :, ::stride, ::stride].set(y + bias.reshape(1, -1, 1, 1))
    return out


if __name__ == "__main__":
    key = jax.random.PRNGKey(0)
    k1, k2, k3, k4, k5 = jax.random.split(key, 5)

    N, Cin, H, W = 2, 4, 16, 16
    Cout = 8
    stride = 2

    x = jax.random.normal(k1, (N, Cin, H, W), jnp.float32)
    # BatchNorm2d affine params (PyTorch init is weight=1, bias=0; perturb a bit).
    gamma = 1.0 + 0.1 * jax.random.normal(k2, (Cin,), jnp.float32)
    beta = 0.1 * jax.random.normal(k3, (Cin,), jnp.float32)
    # ConvTranspose2d weight (Cin, Cout, 1, 1) -> squeezed to (Cin, Cout); plus bias.
    w = 0.5 * jax.random.normal(k4, (Cin, Cout), jnp.float32)
    bias = 0.1 * jax.random.normal(k5, (Cout,), jnp.float32)

    fwd = jax.jit(basic_us_block1_forward, static_argnames=("stride",))
    out = jax.block_until_ready(fwd(x, gamma, beta, w, bias, stride=stride))

    ref = _reference(x, gamma, beta, w, bias, stride=stride)
    assert out.shape == (N, Cout, (H - 1) * stride + 2, (W - 1) * stride + 2)
    assert jnp.allclose(out, ref, atol=1e-4, rtol=1e-4), "mismatch vs reference"

    print("KERNEL_OK")
</pallas_src>

<mosaic_0001>
module attributes {stable_mosaic.version = 11 : i64} {
  func.func @_bn_relu_deconv1x1_kernel(%arg0: i32, %arg1: memref<2x4x256xf32, #tpu.memory_space<vmem>>, %arg2: memref<1x4x1xf32, #tpu.memory_space<vmem>>, %arg3: memref<1x4x1xf32, #tpu.memory_space<vmem>>, %arg4: memref<4x8x1xf32, #tpu.memory_space<vmem>>, %arg5: memref<2x8x256xf32, #tpu.memory_space<vmem>>) attributes {dimension_semantics = [#tpu.dimension_semantics<arbitrary>], iteration_bounds = array<i64: 1>, scalar_prefetch = 0 : i64, scratch_operands = 0 : i64, tpu.core_type = #tpu.core_type<tc>, window_params = [{pipeline_mode = #tpu.pipeline_mode<synchronous>, transform_indices = @transform_0, window_bounds = array<i64: 2, 4, 256>}, {pipeline_mode = #tpu.pipeline_mode<synchronous>, transform_indices = @transform_1, window_bounds = array<i64: 1, 4, 1>}, {pipeline_mode = #tpu.pipeline_mode<synchronous>, transform_indices = @transform_2, window_bounds = array<i64: 1, 4, 1>}, {pipeline_mode = #tpu.pipeline_mode<synchronous>, transform_indices = @transform_3, window_bounds = array<i64: 4, 8, 1>}, {pipeline_mode = #tpu.pipeline_mode<synchronous>, transform_indices = @transform_4, window_bounds = array<i64: 2, 8, 256>}]} {
    %c0 = arith.constant 0 : index
    %c0_0 = arith.constant 0 : index
    %c0_1 = arith.constant 0 : index
    %0 = vector.load %arg1[%c0, %c0_0, %c0_1] : memref<2x4x256xf32, #tpu.memory_space<vmem>>, vector<2x4x256xf32>
    %cst = arith.constant dense<0.000000e+00> : vector<2x4xf32>
    %1 = vector.multi_reduction <add>, %0, %cst [2] : vector<2x4x256xf32> to vector<2x4xf32>
    %2 = vector.shape_cast %1 : vector<2x4xf32> to vector<2x4x1xf32>
    %cst_2 = arith.constant dense<0.000000e+00> : vector<4x1xf32>
    %3 = vector.multi_reduction <add>, %2, %cst_2 [0] : vector<2x4x1xf32> to vector<4x1xf32>
    %4 = vector.shape_cast %3 : vector<4x1xf32> to vector<1x4x1xf32>
    %cst_3 = arith.constant 0.001953125 : f32
    %5 = vector.broadcast %cst_3 : f32 to vector<1x4x1xf32>
    %6 = arith.mulf %4, %5 : vector<1x4x1xf32>
    %7 = vector.broadcast %6 : vector<1x4x1xf32> to vector<2x4x256xf32>
    %8 = arith.subf %0, %7 : vector<2x4x256xf32>
    %9 = arith.mulf %8, %8 : vector<2x4x256xf32>
    %cst_4 = arith.constant dense<0.000000e+00> : vector<2x4xf32>
    %10 = vector.multi_reduction <add>, %9, %cst_4 [2] : vector<2x4x256xf32> to vector<2x4xf32>
    %11 = vector.shape_cast %10 : vector<2x4xf32> to vector<2x4x1xf32>
    %cst_5 = arith.constant dense<0.000000e+00> : vector<4x1xf32>
    %12 = vector.multi_reduction <add>, %11, %cst_5 [0] : vector<2x4x1xf32> to vector<4x1xf32>
    %13 = vector.shape_cast %12 : vector<4x1xf32> to vector<1x4x1xf32>
    %cst_6 = arith.constant 0.001953125 : f32
    %14 = vector.broadcast %cst_6 : f32 to vector<1x4x1xf32>
    %15 = arith.mulf %13, %14 : vector<1x4x1xf32>
    %cst_7 = arith.constant 9.99999974E-6 : f32
    %16 = vector.broadcast %cst_7 : f32 to vector<1x4x1xf32>
    %17 = arith.addf %15, %16 : vector<1x4x1xf32>
    %18 = math.rsqrt %17 : vector<1x4x1xf32>
    %c0_8 = arith.constant 0 : index
    %c0_9 = arith.constant 0 : index
    %c0_10 = arith.constant 0 : index
    %19 = vector.load %arg2[%c0_8, %c0_9, %c0_10] : memref<1x4x1xf32, #tpu.memory_space<vmem>>, vector<1x4x1xf32>
    %20 = arith.mulf %18, %19 : vector<1x4x1xf32>
    %21 = vector.broadcast %20 : vector<1x4x1xf32> to vector<2x4x256xf32>
    %22 = arith.mulf %8, %21 : vector<2x4x256xf32>
    %c0_11 = arith.constant 0 : index
    %c0_12 = arith.constant 0 : index
    %c0_13 = arith.constant 0 : index
    %23 = vector.load %arg3[%c0_11, %c0_12, %c0_13] : memref<1x4x1xf32, #tpu.memory_space<vmem>>, vector<1x4x1xf32>
    %24 = vector.broadcast %23 : vector<1x4x1xf32> to vector<2x4x256xf32>
    %25 = arith.addf %22, %24 : vector<2x4x256xf32>
    %cst_14 = arith.constant 0.000000e+00 : f32
    %26 = vector.broadcast %cst_14 : f32 to vector<2x4x256xf32>
    %27 = arith.maximumf %25, %26 : vector<2x4x256xf32>
    %c0_15 = arith.constant 0 : index
    %c0_16 = arith.constant 0 : index
    %c0_17 = arith.constant 0 : index
    %28 = vector.load %arg4[%c0_15, %c0_16, %c0_17] : memref<4x8x1xf32, #tpu.memory_space<vmem>>, vector<4x8x1xf32>
    %29 = vector.extract_strided_slice %27 {offsets = [0, 0, 0], sizes = [2, 1, 256], strides = [1, 1, 1]} : vector<2x4x256xf32> to vector<2x1x256xf32>
    %30 = vector.extract_strided_slice %28 {offsets = [0, 0, 0], sizes = [1, 8, 1], strides = [1, 1, 1]} : vector<4x8x1xf32> to vector<1x8x1xf32>
    %31 = vector.broadcast %29 : vector<2x1x256xf32> to vector<2x8x256xf32>
    %32 = vector.broadcast %30 : vector<1x8x1xf32> to vector<2x8x256xf32>
    %33 = arith.mulf %31, %32 : vector<2x8x256xf32>
    %34 = vector.extract_strided_slice %27 {offsets = [0, 1, 0], sizes = [2, 1, 256], strides = [1, 1, 1]} : vector<2x4x256xf32> to vector<2x1x256xf32>
    %35 = vector.extract_strided_slice %28 {offsets = [1, 0, 0], sizes = [1, 8, 1], strides = [1, 1, 1]} : vector<4x8x1xf32> to vector<1x8x1xf32>
    %36 = vector.broadcast %34 : vector<2x1x256xf32> to vector<2x8x256xf32>
    %37 = vector.broadcast %35 : vector<1x8x1xf32> to vector<2x8x256xf32>
    %38 = arith.mulf %36, %37 : vector<2x8x256xf32>
    %39 = arith.addf %33, %38 : vector<2x8x256xf32>
    %40 = vector.extract_strided_slice %27 {offsets = [0, 2, 0], sizes = [2, 1, 256], strides = [1, 1, 1]} : vector<2x4x256xf32> to vector<2x1x256xf32>
    %41 = vector.extract_strided_slice %28 {offsets = [2, 0, 0], sizes = [1, 8, 1], strides = [1, 1, 1]} : vector<4x8x1xf32> to vector<1x8x1xf32>
    %42 = vector.broadcast %40 : vector<2x1x256xf32> to vector<2x8x256xf32>
    %43 = vector.broadcast %41 : vector<1x8x1xf32> to vector<2x8x256xf32>
    %44 = arith.mulf %42, %43 : vector<2x8x256xf32>
    %45 = arith.addf %39, %44 : vector<2x8x256xf32>
    %46 = vector.extract_strided_slice %27 {offsets = [0, 3, 0], sizes = [2, 1, 256], strides = [1, 1, 1]} : vector<2x4x256xf32> to vector<2x1x256xf32>
    %47 = vector.extract_strided_slice %28 {offsets = [3, 0, 0], sizes = [1, 8, 1], strides = [1, 1, 1]} : vector<4x8x1xf32> to vector<1x8x1xf32>
    %48 = vector.broadcast %46 : vector<2x1x256xf32> to vector<2x8x256xf32>
    %49 = vector.broadcast %47 : vector<1x8x1xf32> to vector<2x8x256xf32>
    %50 = arith.mulf %48, %49 : vector<2x8x256xf32>
    %51 = arith.addf %45, %50 : vector<2x8x256xf32>
    %c0_18 = arith.constant 0 : index
    %c0_19 = arith.constant 0 : index
    %c0_20 = arith.constant 0 : index
    %52 = vector.load %arg5[%c0_18, %c0_19, %c0_20] : memref<2x8x256xf32, #tpu.memory_space<vmem>>, vector<2x8x256xf32>
    tpu.vector_store %arg5[%c0_18, %c0_19, %c0_20], %51 {strides = array<i32>} : memref<2x8x256xf32, #tpu.memory_space<vmem>>, vector<2x8x256xf32>,
    return
  }
  func.func @transform_0(%arg0: i32) -> (i32, i32, i32) {
    %c0_i32 = arith.constant 0 : i32
    %c0_i32_0 = arith.constant 0 : i32
    %c0_i32_1 = arith.constant 0 : i32
    %c0_i32_2 = arith.constant 0 : i32
    return %c0_i32, %c0_i32_0, %c0_i32_1 : i32, i32, i32
  }
  func.func @transform_1(%arg0: i32) -> (i32, i32, i32) {
    %c0_i32 = arith.constant 0 : i32
    %c0_i32_0 = arith.constant 0 : i32
    %c0_i32_1 = arith.constant 0 : i32
    %c0_i32_2 = arith.constant 0 : i32
    return %c0_i32, %c0_i32_0, %c0_i32_1 : i32, i32, i32
  }
  func.func @transform_2(%arg0: i32) -> (i32, i32, i32) {
    %c0_i32 = arith.constant 0 : i32
    %c0_i32_0 = arith.constant 0 : i32
    %c0_i32_1 = arith.constant 0 : i32
    %c0_i32_2 = arith.constant 0 : i32
    return %c0_i32, %c0_i32_0, %c0_i32_1 : i32, i32, i32
  }
  func.func @transform_3(%arg0: i32) -> (i32, i32, i32) {
    %c0_i32 = arith.constant 0 : i32
    %c0_i32_0 = arith.constant 0 : i32
    %c0_i32_1 = arith.constant 0 : i32
    %c0_i32_2 = arith.constant 0 : i32
    return %c0_i32, %c0_i32_0, %c0_i32_1 : i32, i32, i32
  }
  func.func @transform_4(%arg0: i32) -> (i32, i32, i32) {
    %c0_i32 = arith.constant 0 : i32
    %c0_i32_0 = arith.constant 0 : i32
    %c0_i32_1 = arith.constant 0 : i32
    %c0_i32_2 = arith.constant 0 : i32
    return %c0_i32, %c0_i32_0, %c0_i32_1 : i32, i32, i32
  }
}

</mosaic_0001>

<bundles_post_ra>
// kernel: basic_us_block1_forward.1
= control target key start
LH: loop header
LB: loop body
LE: loop exit
PB: predicated region body
PF: predicated region fallthrough
CT: control target
= control target key end

     0   :  { %vm25_vm0 = vcmask 1043456   ;;  %v322_v10 = vmov 839922192   ;;  %v44_v12 = vlaneseq  ;;  %v323_v35 = vmov 0   ;;  %s408_s0 = inlined_call_operand.vmem [shape: f32[2,4,256], index: 0, kind: input, shape index: {}]   ;;  %s409_s2 = inlined_call_operand.vmem [shape: f32[1,4,1], index: 2, kind: input, shape index: {}]   ;;  %s410_s3 = inlined_call_operand.vmem [shape: f32[4,8,1], index: 3, kind: input, shape index: {}]   ;;  %s411_s1 = inlined_call_operand.vmem [shape: f32[1,4,1], index: 1, kind: input, shape index: {}]   ;;  %s412_s4 = inlined_call_operand.vmem [shape: f32[2,8,256], index: 4, kind: output, shape index: {}]  }
   0x1   :  { %v17_v0 = vld [vmem:[%s408_s0] sm:$0xff]  ;;  %v18_v1 = vld [vmem:[%s408_s0 + $0x8] sm:$0xff]  ;;  %v42_v11 = vunpack.c.l.s4 %v322_v10  ;;  %317 = vset.pattern.permute.xlu1 %v323_v35  ;;  %316 = vset.pattern.permute.xlu0 %v323_v35  ;;  %v110_v39 = vld [vmem:[%s410_s3 + $0x10] sm:$0xff] }
   0x2   :  { %v21_v2 = vcombine.high %v17_v0, %v17_v0  ;;  %v26_v3 = vsel %vm25_vm0, %v17_v0, 0.0  ;;  %v22_v4 = vcombine.high %v18_v1, %v18_v1  ;;  %v31_v6 = vsel %vm25_vm0, %v18_v1, 0.0  ;;  %v91_v36 = vld [vmem:[%s409_s2] sm:$0xf]  ;;  %v109_v38 = vld [vmem:[%s410_s3 + $0x8] sm:$0xff]  ;;  %v111_v40 = vld [vmem:[%s410_s3 + $0x18] sm:$0xff] }
   0x3   :  { %v43_v14 = vunpack.c.0.s8 %v42_v11  ;;  %v359_v15 = vshrl.u32 %v44_v12, 7  ;;  %v108_v37 = vld [vmem:[%s410_s3] sm:$0xff] }
   0x4   :  { %v27_v5 = vsel %vm25_vm0, %v21_v2, 0.0  ;;  %v32_v7 = vsel %vm25_vm0, %v22_v4, 0.0  ;;  %v75_v48 = vld [vmem:[%s411_s1] sm:$0xf] }
   0x5   :  { %v28_v8 = vadd.f32 %v27_v5, %v26_v3  ;;  %v33_v9 = vadd.f32 %v32_v7, %v31_v6  ;;  %v46_v19 = vsub.s32 %v43_v14, %v359_v15  ;;  %v116_v60 = vsub.s32 0, %v359_v15 }
   0x6   :  { %v120_v61 = vsub.s32 4, %v359_v15  ;;  %v161_v62 = vsub.s32 1, %v359_v15  ;;  %v165_v63 = vsub.s32 5, %v359_v15  ;;  %v210_v2 = vsub.s32 2, %v359_v15 }
   0x7   :  { %29 = vadd.xlane.f32.xlu0 %v28_v8  ;;  %v214_v3 = vsub.s32 6, %v359_v15  ;;  %v259_v4 = vsub.s32 3, %v359_v15  ;;  %v263_v5 = vsub.s32 7, %v359_v15 }
   0xb   :  { %34 = vadd.xlane.f32.xlu0 %v33_v9 }
  0x90   :  { %v30_v13 = vpop.xlane.xlu0 %29 }
  0x91   :  { %v36_v17 = vsel %vm25_vm0, %v30_v13, 0.0 }
  0x94   :  { %v35_v16 = vpop.xlane.xlu0 %34 }
  0x95   :  { %v37_v18 = vsel %vm25_vm0, %v35_v16, 0.0 }
  0x96   :  { %v38_v20 = vadd.f32 %v37_v18, %v36_v17 }
  0x98   :  { %v39_v21 = vmul.f32 0.001953125, %v38_v20 }
  0x9a   :  { %v47_v22 = vrot.slane %v39_v21, %v46_v19 }
  0x9c   :  { %v50_v23 = vsub.f32 %v18_v1, %v47_v22  ;;  %v49_v24 = vsub.f32 %v17_v0, %v47_v22 }
  0x9e   :  { %v51_v25 = vmul.f32 %v49_v24, %v49_v24  ;;  %v52_v26 = vmul.f32 %v50_v23, %v50_v23 }
  0xa0   :  { %v55_v27 = vcombine.high %v51_v25, %v51_v25  ;;  %v56_v28 = vcombine.high %v52_v26, %v52_v26  ;;  %v59_v29 = vsel %vm25_vm0, %v51_v25, 0.0  ;;  %v64_v33 = vsel %vm25_vm0, %v52_v26, 0.0 }
  0xa2   :  { %v60_v30 = vsel %vm25_vm0, %v55_v27, 0.0  ;;  %v65_v32 = vsel %vm25_vm0, %v56_v28, 0.0 }
  0xa3   :  { %v61_v31 = vadd.f32 %v60_v30, %v59_v29  ;;  %v66_v34 = vadd.f32 %v65_v32, %v64_v33 }
  0xa5   :  { %62 = vadd.xlane.f32.xlu1 %v61_v31 }
  0xa9   :  { %67 = vadd.xlane.f32.xlu1 %v66_v34 }
  0xba   :  { %94 = vperm.xlu1 %317, %v91_v36  }
  0xbe   :  { %152 = vperm.xlu1 %317, %v108_v37  }
  0xc2   :  { %197 = vperm.xlu1 %317, %v109_v38  }
  0xc6   :  { %246 = vperm.xlu1 %317, %v110_v39  }
  0xca   :  { %295 = vperm.xlu1 %317, %v111_v40  }
 0x12e   :  { %v63_v41 = vpop.xlane.xlu1 %62 }
 0x12f   :  { %v69_v43 = vsel %vm25_vm0, %v63_v41, 0.0 }
 0x132   :  { %v68_v42 = vpop.xlane.xlu1 %67 }
 0x133   :  { %v70_v44 = vsel %vm25_vm0, %v68_v42, 0.0 }
 0x134   :  { %v71_v45 = vadd.f32 %v70_v44, %v69_v43 }
 0x136   :  { %v72_v46 = vmul.f32 0.001953125, %v71_v45  ;;  %v95_v51 = vpop.permute.xlu1 %94 }
 0x137   :  { %v102_v54 = vrot.slane %v95_v51, %v46_v19 }
 0x138   :  { %v73_v47 = vadd.f32 1e-05, %v72_v46 }
 0x13a   :  { %320 = vrsqrt.f32 %v73_v47  ;;  %v153_v55 = vpop.permute.xlu1 %152 }
 0x13e   :  { %v198_v6 = vpop.permute.xlu1 %197 }
 0x142   :  { %v247_v31 = vpop.permute.xlu1 %246 }
 0x147   :  { %v321_v49 = vpop.eup %320 }
 0x148   :  { %v76_v50 = vmul.f32 %v321_v49, %v75_v48 }
 0x14a   :  { %79 = vperm.xlu0 %316, %v76_v50  }
 0x1c5   :  { %v80_v52 = vpop.permute.xlu0 %79 }
 0x1c6   :  { %v87_v53 = vrot.slane %v80_v52, %v46_v19 }
 0x1c8   :  { %v89_v56 = vmul.f32 %v87_v53, %v49_v24  ;;  %v90_v57 = vmul.f32 %v87_v53, %v50_v23 }
 0x1ca   :  { %v104_v58 = vadd.f32 %v102_v54, %v89_v56  ;;  %v105_v59 = vadd.f32 %v102_v54, %v90_v57 }
 0x1cc   :  { %v106_v0 = vmax.f32 %v104_v58, 0.0  ;;  %v107_v1 = vmax.f32 %v105_v59, 0.0 }
 0x1ce   :  { %v117_v7 = vrot.slane %v106_v0, %v116_v60  ;;  %v121_v8 = vrot.slane %v106_v0, %v120_v61  ;;  %v125_v9 = vrot.slane %v107_v1, %v116_v60  ;;  %v129_v10 = vrot.slane %v107_v1, %v120_v61 }
 0x1cf   :  { %v162_v11 = vrot.slane %v106_v0, %v161_v62  ;;  %v166_v12 = vrot.slane %v106_v0, %v165_v63  ;;  %v170_v13 = vrot.slane %v107_v1, %v161_v62  ;;  %v174_v14 = vrot.slane %v107_v1, %v165_v63 }
 0x1d0   :  { %v137_v16 = vrot.slane %v117_v7, %v116_v60  ;;  %v141_v17 = vrot.slane %v121_v8, %v116_v60  ;;  %v145_v18 = vrot.slane %v125_v9, %v116_v60  ;;  %v149_v19 = vrot.slane %v129_v10, %v116_v60  ;;  %v296_v60 = vpop.permute.xlu1 %295 }
 0x1d1   :  { %v182_v20 = vrot.slane %v162_v11, %v161_v62  ;;  %v186_v21 = vrot.slane %v166_v12, %v161_v62  ;;  %v190_v22 = vrot.slane %v170_v13, %v161_v62  ;;  %v194_v23 = vrot.slane %v174_v14, %v161_v62 }
 0x1d2   :  { %v155_v24 = vmul.f32 %v153_v55, %v137_v16  ;;  %v156_v25 = vmul.f32 %v153_v55, %v141_v17  ;;  %v157_v15 = vmul.f32 %v153_v55, %v145_v18  ;;  %v158_v26 = vmul.f32 %v153_v55, %v149_v19 }
 0x1d3   :  { %v200_v27 = vmul.f32 %v198_v6, %v182_v20  ;;  %v201_v28 = vmul.f32 %v198_v6, %v186_v21  ;;  %v202_v29 = vmul.f32 %v198_v6, %v190_v22  ;;  %v203_v30 = vmul.f32 %v198_v6, %v194_v23 }
 0x1d4   :  { %v211_v32 = vrot.slane %v106_v0, %v210_v2  ;;  %v215_v33 = vrot.slane %v106_v0, %v214_v3  ;;  %v219_v34 = vrot.slane %v107_v1, %v210_v2  ;;  %v223_v35 = vrot.slane %v107_v1, %v214_v3 }
 0x1d5   :  { %v204_v36 = vadd.f32 %v200_v27, %v155_v24  ;;  %v205_v37 = vadd.f32 %v201_v28, %v156_v25  ;;  %v206_v38 = vadd.f32 %v202_v29, %v157_v15  ;;  %v207_v39 = vadd.f32 %v203_v30, %v158_v26 }
 0x1d6   :  { %v231_v40 = vrot.slane %v211_v32, %v210_v2  ;;  %v235_v41 = vrot.slane %v215_v33, %v210_v2  ;;  %v239_v42 = vrot.slane %v219_v34, %v210_v2  ;;  %v243_v43 = vrot.slane %v223_v35, %v210_v2 }
 0x1d7   :  { %v260_v44 = vrot.slane %v106_v0, %v259_v4  ;;  %v264_v45 = vrot.slane %v106_v0, %v263_v5  ;;  %v268_v46 = vrot.slane %v107_v1, %v259_v4  ;;  %v272_v47 = vrot.slane %v107_v1, %v263_v5 }
 0x1d8   :  { %v249_v48 = vmul.f32 %v247_v31, %v231_v40  ;;  %v250_v49 = vmul.f32 %v247_v31, %v235_v41  ;;  %v251_v50 = vmul.f32 %v247_v31, %v239_v42  ;;  %v252_v51 = vmul.f32 %v247_v31, %v243_v43 }
 0x1d9   :  { %v280_v52 = vrot.slane %v260_v44, %v259_v4  ;;  %v284_v53 = vrot.slane %v264_v45, %v259_v4  ;;  %v288_v54 = vrot.slane %v268_v46, %v259_v4  ;;  %v292_v55 = vrot.slane %v272_v47, %v259_v4 }
 0x1da   :  { %v253_v56 = vadd.f32 %v249_v48, %v204_v36  ;;  %v254_v57 = vadd.f32 %v250_v49, %v205_v37  ;;  %v255_v58 = vadd.f32 %v251_v50, %v206_v38  ;;  %v256_v59 = vadd.f32 %v252_v51, %v207_v39 }
 0x1db   :  { %v298_v61 = vmul.f32 %v296_v60, %v280_v52  ;;  %v299_v62 = vmul.f32 %v296_v60, %v284_v53  ;;  %v300_v63 = vmul.f32 %v296_v60, %v288_v54  ;;  %v301_v2 = vmul.f32 %v296_v60, %v292_v55 }
 0x1dd   :  { %v302_v0 = vadd.f32 %v298_v61, %v253_v56  ;;  %v303_v3 = vadd.f32 %v299_v62, %v254_v57  ;;  %v304_v1 = vadd.f32 %v300_v63, %v255_v58  ;;  %v305_v5 = vadd.f32 %v301_v2, %v256_v59 }
 0x1df   :  { %306 = vst [vmem:[%s412_s4] sm:$0xff] %v302_v0  ;;  %307 = vst [vmem:[%s412_s4 + $0x8] sm:$0xff] %v303_v3 }
 0x1e0   :  { %308 = vst [vmem:[%s412_s4 + $0x10] sm:$0xff] %v304_v1  ;;  %309 = vst [vmem:[%s412_s4 + $0x18] sm:$0xff] %v305_v5 }

</bundles_post_ra>
